<compile_context>
chip_gen: v7x
topology: tpu7x:2x2x1
jax: 0.10.0
libtpu: 0.0.40
codegen_flags: <defaults>
</compile_context>

<pallas_src>
import math
import functools

import jax
import jax.numpy as jnp
from jax.experimental import pallas as pl
from jax.experimental.pallas import tpu as pltpu


def _round_up(x, m):
    return (x + m - 1) // m * m


def _softmax_last(x):
    m = jnp.max(x, axis=-1, keepdims=True)
    e = jnp.exp(x - m)
    return e * pl.reciprocal(jnp.sum(e, axis=-1, keepdims=True), approx=False)


def _cmi_kernel(img_ref, txt_ref, w_ref, b_ref, img_out_ref, txt_out_ref,
                *, E, CE):
    f32 = jnp.float32
    bb, Ni, _ = img_ref.shape
    _, Nt, _ = txt_ref.shape

    x_i = img_ref[...]                               # (bb, Ni, E)
    x_t = txt_ref[...]                               # (bb, Nt, E)
    xi2 = x_i.reshape(bb * Ni, E)                    # flat rows for MXU M-fill
    xt2 = x_t.reshape(bb * Nt, E)

    # ---- fused QKV projections (1/sqrt(E) already folded into Q cols) ------
    # Each Q/K/V section is padded to CE lanes, so the slices below are
    # lane-tile-aligned free views.
    qkv_i = (jnp.dot(xi2, w_ref[0:E, 0:3 * CE],
                     preferred_element_type=f32) + b_ref[0:1, :])
    qkv_t = (jnp.dot(xt2, w_ref[E:2 * E, 0:3 * CE],
                     preferred_element_type=f32) + b_ref[1:2, :])

    qkv_i = qkv_i.reshape(bb, Ni, 3 * CE)
    qkv_t = qkv_t.reshape(bb, Nt, 3 * CE)
    iQ, iK, iV = (qkv_i[:, :, 0:CE], qkv_i[:, :, CE:2 * CE], qkv_i[:, :, 2 * CE:3 * CE])
    tQ, tK, tV = (qkv_t[:, :, 0:CE], qkv_t[:, :, CE:2 * CE], qkv_t[:, :, 2 * CE:3 * CE])

    # ---- cross attention (batched over the bb block, transpose-free QK^T) --
    # images attend over text
    s_i = jnp.einsum("bqc,bkc->bqk", iQ, tK, preferred_element_type=f32)
    feat_i = jnp.einsum("bqk,bkc->bqc", _softmax_last(s_i), tV,
                        preferred_element_type=f32)       # (bb, Ni, CE)
    # text attends over images
    s_t = jnp.einsum("bqc,bkc->bqk", tQ, iK, preferred_element_type=f32)
    feat_t = jnp.einsum("bqk,bkc->bqc", _softmax_last(s_t), iV,
                        preferred_element_type=f32)       # (bb, Nt, CE)

    feat_i2 = feat_i.reshape(bb * Ni, CE)
    feat_t2 = feat_t.reshape(bb * Nt, CE)

    # ---- fuse Linear(2E -> E), concat-free split form -----------------------
    # out = x @ W[:E] + attended @ W[E:]  (attended is CE wide, padded rows of
    # the slab are zero so the extra contraction terms vanish).
    img_out = (jnp.dot(xi2, w_ref[0:E, 3 * CE:3 * CE + E],
                       preferred_element_type=f32)
               + jnp.dot(feat_i2, w_ref[E:E + CE, 3 * CE:3 * CE + E],
                         preferred_element_type=f32)
               + b_ref[2:3, 0:E])
    txt_out = (jnp.dot(xt2, w_ref[0:E, 4 * CE:4 * CE + E],
                       preferred_element_type=f32)
               + jnp.dot(feat_t2, w_ref[E:E + CE, 4 * CE:4 * CE + E],
                         preferred_element_type=f32)
               + b_ref[3:4, 0:E])

    img_out_ref[...] = img_out.reshape(bb, Ni, E).astype(img_out_ref.dtype)
    txt_out_ref[...] = txt_out.reshape(bb, Nt, E).astype(txt_out_ref.dtype)


def cross_modal_interaction_pallas(images, texts, w_slab, b_slab, *,
                                   batch_block=1):
    B, Ni, E = images.shape
    _, Nt, _ = texts.shape
    CE = _round_up(E, 128)
    bb = batch_block
    assert B % bb == 0, "batch_block must divide B"

    kernel = functools.partial(_cmi_kernel, E=E, CE=CE)

    # Advisory cost estimate (counts padded MXU work).
    flops = (2 * B * (Ni + Nt) * E * 3 * CE            # fused QKV
             + 8 * B * Ni * Nt * CE                    # QK^T + PV, both paths
             + 2 * B * (Ni + Nt) * (E + CE) * E)       # fuse matmuls
    transcendentals = 2 * B * Ni * Nt
    bytes_accessed = 4 * (images.size + texts.size + w_slab.size + b_slab.size
                          + B * (Ni + Nt) * E)
    cost = pl.CostEstimate(flops=int(flops),
                           transcendentals=int(transcendentals),
                           bytes_accessed=int(bytes_accessed))

    img_out, txt_out = pl.pallas_call(
        kernel,
        out_shape=(
            jax.ShapeDtypeStruct((B, Ni, E), jnp.float32),
            jax.ShapeDtypeStruct((B, Nt, E), jnp.float32),
        ),
        grid_spec=pltpu.PrefetchScalarGridSpec(
            num_scalar_prefetch=0,
            grid=(B // bb,),
            in_specs=[
                pl.BlockSpec((bb, Ni, E), lambda b: (b, 0, 0)),
                pl.BlockSpec((bb, Nt, E), lambda b: (b, 0, 0)),
                pl.BlockSpec(w_slab.shape, lambda b: (0, 0)),
                pl.BlockSpec(b_slab.shape, lambda b: (0, 0)),
            ],
            out_specs=[
                pl.BlockSpec((bb, Ni, E), lambda b: (b, 0, 0)),
                pl.BlockSpec((bb, Nt, E), lambda b: (b, 0, 0)),
            ],
        ),
        compiler_params=pltpu.CompilerParams(
            dimension_semantics=("parallel",),
            vmem_limit_bytes=32 * 1024 * 1024),
        cost_estimate=cost,
    )(images, texts, w_slab, b_slab)

    return img_out, txt_out


def pack_params(p, E):
    """Pack (in, out)-layout weights / biases into lane-aligned kernel slabs.

    W slab (E + CE, 5*CE), CE = round_up(E, 128):
      cols [0      : 3*CE]   fused QKV (Q|K|V, each section CE wide, zero pad),
                             rows [0:E] image weights, rows [E:2E] text weights.
                             Q columns/bias pre-scaled by 1/sqrt(E).
      cols [3*CE   : 4*CE]   image fuse Linear(2E->E): rows [0:E] x-part,
                             rows [E:E+CE] attended-part (rows 2E: are zero).
      cols [4*CE   : 5*CE]   text fuse, same layout.
    bias slab (4, 3*CE): rows = [qkv_img, qkv_txt, fuse_img, fuse_txt].
    """
    CE = _round_up(E, 128)
    scale = 1.0 / math.sqrt(E)

    w = jnp.zeros((E + CE, 5 * CE), jnp.float32)
    # image QKV (rows 0:E)
    w = w.at[0:E, 0:E].set(p["wiq"] * scale)
    w = w.at[0:E, CE:CE + E].set(p["wik"])
    w = w.at[0:E, 2 * CE:2 * CE + E].set(p["wiv"])
    # text QKV (rows E:2E)
    w = w.at[E:2 * E, 0:E].set(p["wtq"] * scale)
    w = w.at[E:2 * E, CE:CE + E].set(p["wtk"])
    w = w.at[E:2 * E, 2 * CE:2 * CE + E].set(p["wtv"])
    # fuse weights, split into x-part (rows 0:E) and attended-part (rows E:2E)
    w = w.at[0:E, 3 * CE:3 * CE + E].set(p["wimg"][0:E])
    w = w.at[E:2 * E, 3 * CE:3 * CE + E].set(p["wimg"][E:2 * E])
    w = w.at[0:E, 4 * CE:4 * CE + E].set(p["wtxt"][0:E])
    w = w.at[E:2 * E, 4 * CE:4 * CE + E].set(p["wtxt"][E:2 * E])

    b = jnp.zeros((4, 3 * CE), jnp.float32)
    b = b.at[0, 0:E].set(p["biq"] * scale)
    b = b.at[0, CE:CE + E].set(p["bik"])
    b = b.at[0, 2 * CE:2 * CE + E].set(p["biv"])
    b = b.at[1, 0:E].set(p["btq"] * scale)
    b = b.at[1, CE:CE + E].set(p["btk"])
    b = b.at[1, 2 * CE:2 * CE + E].set(p["btv"])
    b = b.at[2, 0:E].set(p["bimg"])
    b = b.at[3, 0:E].set(p["btxt"])
    return w, b


def cross_modal_interaction_ref(images, texts, p):
    """Pure-JAX reference matching the PyTorch forward."""
    E = images.shape[-1]
    scale = 1.0 / math.sqrt(E)

    iK = images @ p["wik"] + p["bik"]
    iQ = images @ p["wiq"] + p["biq"]
    iV = images @ p["wiv"] + p["biv"]
    tK = texts @ p["wtk"] + p["btk"]
    tQ = texts @ p["wtq"] + p["btq"]
    tV = texts @ p["wtv"] + p["btv"]

    att_T2V = jax.nn.softmax(jnp.einsum("bqe,bke->bqk", iQ, tK) * scale, axis=-1)
    image_feature = jnp.einsum("bqk,bke->bqe", att_T2V, tV)
    att_V2T = jax.nn.softmax(jnp.einsum("bqe,bke->bqk", tQ, iK) * scale, axis=-1)
    text_feature = jnp.einsum("bqk,bke->bqe", att_V2T, iV)

    img_out = jnp.concatenate([images, image_feature], -1) @ p["wimg"] + p["bimg"]
    txt_out = jnp.concatenate([texts, text_feature], -1) @ p["wtxt"] + p["btxt"]
    return img_out, txt_out


def init_params(key, E):
    r = math.sqrt(6.0) / math.sqrt(E + E)           # xavier range for E -> E
    r1 = math.sqrt(6.0) / math.sqrt(2 * E + E)      # xavier range for 2E -> E
    ks = jax.random.split(key, 16)

    def u(k, shape, rad):
        return jax.random.uniform(k, shape, jnp.float32, -rad, rad)

    # Weights stored as (in, out) (i.e. torch W transposed); biases as (E,).
    # Biases are given small random values so the bias path is exercised.
    return dict(
        wiq=u(ks[0], (E, E), r), wik=u(ks[1], (E, E), r), wiv=u(ks[2], (E, E), r),
        wtq=u(ks[3], (E, E), r), wtk=u(ks[4], (E, E), r), wtv=u(ks[5], (E, E), r),
        wimg=u(ks[6], (2 * E, E), r1), wtxt=u(ks[7], (2 * E, E), r1),
        biq=u(ks[8], (E,), 0.1), bik=u(ks[9], (E,), 0.1), biv=u(ks[10], (E,), 0.1),
        btq=u(ks[11], (E,), 0.1), btk=u(ks[12], (E,), 0.1), btv=u(ks[13], (E,), 0.1),
        bimg=u(ks[14], (E,), 0.1), btxt=u(ks[15], (E,), 0.1),
    )


if __name__ == "__main__":
    B, N_IMG, N_TXT, E = 2, 16, 8, 32

    key = jax.random.PRNGKey(0)
    k_img, k_txt, k_param = jax.random.split(key, 3)
    images = jax.random.normal(k_img, (B, N_IMG, E), jnp.float32)
    texts = jax.random.normal(k_txt, (B, N_TXT, E), jnp.float32)
    params = init_params(k_param, E)
    w_slab, b_slab = pack_params(params, E)

    # batch_block=1 -> grid=(B,), one batch element per step (parallel axis for
    # v7x's two TensorCores). On v5e/v6e, raise batch_block to amortise the
    # per-grid-step overhead.
    img_out, txt_out = jax.block_until_ready(
        cross_modal_interaction_pallas(images, texts, w_slab, b_slab,
                                       batch_block=1))

    img_ref, txt_ref = cross_modal_interaction_ref(images, texts, params)
    assert img_out.shape == (B, N_IMG, E) and txt_out.shape == (B, N_TXT, E)
    assert jnp.allclose(img_out, img_ref, atol=1e-3, rtol=1e-3)
    assert jnp.allclose(txt_out, txt_ref, atol=1e-3, rtol=1e-3)

    print("KERNEL_OK")
</pallas_src>

<mosaic_0001>
module attributes {stable_mosaic.version = 11 : i64} {
  func.func @_cmi_kernel(%arg0: i32, %arg1: memref<1x16x32xf32, #tpu.memory_space<vmem>>, %arg2: memref<1x8x32xf32, #tpu.memory_space<vmem>>, %arg3: memref<160x640xf32, #tpu.memory_space<vmem>>, %arg4: memref<4x384xf32, #tpu.memory_space<vmem>>, %arg5: memref<1x16x32xf32, #tpu.memory_space<vmem>>, %arg6: memref<1x8x32xf32, #tpu.memory_space<vmem>>) attributes {dimension_semantics = [#tpu.dimension_semantics<parallel>], iteration_bounds = array<i64: 2>, scalar_prefetch = 0 : i64, scratch_operands = 0 : i64, tpu.core_type = #tpu.core_type<tc>, window_params = [{transform_indices = @transform_0, window_bounds = array<i64: 1, 16, 32>}, {transform_indices = @transform_1, window_bounds = array<i64: 1, 8, 32>}, {pipeline_mode = #tpu.pipeline_mode<synchronous>, transform_indices = @transform_2, window_bounds = array<i64: 160, 640>}, {pipeline_mode = #tpu.pipeline_mode<synchronous>, transform_indices = @transform_3, window_bounds = array<i64: 4, 384>}, {transform_indices = @transform_4, window_bounds = array<i64: 1, 16, 32>}, {transform_indices = @transform_5, window_bounds = array<i64: 1, 8, 32>}]} {
    %c0 = arith.constant 0 : index
    %c0_0 = arith.constant 0 : index
    %c0_1 = arith.constant 0 : index
    %0 = vector.load %arg1[%c0, %c0_0, %c0_1] : memref<1x16x32xf32, #tpu.memory_space<vmem>>, vector<1x16x32xf32>
    %c0_2 = arith.constant 0 : index
    %c0_3 = arith.constant 0 : index
    %c0_4 = arith.constant 0 : index
    %1 = vector.load %arg2[%c0_2, %c0_3, %c0_4] : memref<1x8x32xf32, #tpu.memory_space<vmem>>, vector<1x8x32xf32>
    %2 = vector.shape_cast %0 : vector<1x16x32xf32> to vector<16x32xf32>
    %3 = vector.shape_cast %1 : vector<1x8x32xf32> to vector<8x32xf32>
    %c0_5 = arith.constant 0 : index
    %c0_6 = arith.constant 0 : index
    %4 = vector.load %arg3[%c0_5, %c0_6] : memref<160x640xf32, #tpu.memory_space<vmem>>, vector<32x384xf32>
    %cst = arith.constant dense<0.000000e+00> : vector<16x384xf32>
    %5 = tpu.matmul %2, %4, %cst {dimension_numbers = #tpu.dot_dimension_numbers<[1], [0], [0], [1], [0, 0, 1, 1], [], []>} : vector<16x32xf32>, vector<32x384xf32>, vector<16x384xf32> -> vector<16x384xf32>
    %c0_7 = arith.constant 0 : index
    %c0_8 = arith.constant 0 : index
    %6 = vector.load %arg4[%c0_7, %c0_8] : memref<4x384xf32, #tpu.memory_space<vmem>>, vector<1x384xf32>
    %7 = vector.broadcast %6 : vector<1x384xf32> to vector<16x384xf32>
    %8 = arith.addf %5, %7 : vector<16x384xf32>
    %c32 = arith.constant 32 : index
    %c0_9 = arith.constant 0 : index
    %9 = vector.load %arg3[%c32, %c0_9] : memref<160x640xf32, #tpu.memory_space<vmem>>, vector<32x384xf32>
    %cst_10 = arith.constant dense<0.000000e+00> : vector<8x384xf32>
    %10 = tpu.matmul %3, %9, %cst_10 {dimension_numbers = #tpu.dot_dimension_numbers<[1], [0], [0], [1], [0, 0, 1, 1], [], []>} : vector<8x32xf32>, vector<32x384xf32>, vector<8x384xf32> -> vector<8x384xf32>
    %c1 = arith.constant 1 : index
    %c0_11 = arith.constant 0 : index
    %11 = vector.load %arg4[%c1, %c0_11] : memref<4x384xf32, #tpu.memory_space<vmem>>, vector<1x384xf32>
    %12 = vector.broadcast %11 : vector<1x384xf32> to vector<8x384xf32>
    %13 = arith.addf %10, %12 : vector<8x384xf32>
    %14 = vector.shape_cast %8 : vector<16x384xf32> to vector<1x16x384xf32>
    %15 = vector.shape_cast %13 : vector<8x384xf32> to vector<1x8x384xf32>
    %16 = vector.extract_strided_slice %14 {offsets = [0, 0, 0], sizes = [1, 16, 128], strides = [1, 1, 1]} : vector<1x16x384xf32> to vector<1x16x128xf32>
    %17 = vector.extract_strided_slice %14 {offsets = [0, 0, 128], sizes = [1, 16, 128], strides = [1, 1, 1]} : vector<1x16x384xf32> to vector<1x16x128xf32>
    %18 = vector.extract_strided_slice %14 {offsets = [0, 0, 256], sizes = [1, 16, 128], strides = [1, 1, 1]} : vector<1x16x384xf32> to vector<1x16x128xf32>
    %19 = vector.extract_strided_slice %15 {offsets = [0, 0, 0], sizes = [1, 8, 128], strides = [1, 1, 1]} : vector<1x8x384xf32> to vector<1x8x128xf32>
    %20 = vector.extract_strided_slice %15 {offsets = [0, 0, 128], sizes = [1, 8, 128], strides = [1, 1, 1]} : vector<1x8x384xf32> to vector<1x8x128xf32>
    %21 = vector.extract_strided_slice %15 {offsets = [0, 0, 256], sizes = [1, 8, 128], strides = [1, 1, 1]} : vector<1x8x384xf32> to vector<1x8x128xf32>
    "tpu.trace_start"() <{level = 10 : i32, message = "bqc,bkc->bqk"}> : () -> ()
    %cst_12 = arith.constant dense<0.000000e+00> : vector<1x16x8xf32>
    %22 = tpu.matmul %16, %20, %cst_12 {dimension_numbers = #tpu.dot_dimension_numbers<[2], [2], [1], [1], [0, 0, 0, 1, 1, 1], [0], [0]>} : vector<1x16x128xf32>, vector<1x8x128xf32>, vector<1x16x8xf32> -> vector<1x16x8xf32>
    "tpu.trace_stop"() : () -> ()
    %cst_13 = arith.constant dense<0xFF800000> : vector<1x16xf32>
    %23 = vector.multi_reduction <maximumf>, %22, %cst_13 [2] : vector<1x16x8xf32> to vector<1x16xf32>
    %24 = vector.shape_cast %23 : vector<1x16xf32> to vector<1x16x1xf32>
    %25 = vector.broadcast %24 : vector<1x16x1xf32> to vector<1x16x8xf32>
    %26 = arith.subf %22, %25 : vector<1x16x8xf32>
    %27 = math.exp %26 : vector<1x16x8xf32>
    %cst_14 = arith.constant dense<0.000000e+00> : vector<1x16xf32>
    %28 = vector.multi_reduction <add>, %27, %cst_14 [2] : vector<1x16x8xf32> to vector<1x16xf32>
    %29 = vector.shape_cast %28 : vector<1x16xf32> to vector<1x16x1xf32>
    %30 = tpu.reciprocal %29 : vector<1x16x1xf32> -> vector<1x16x1xf32>
    %31 = vector.broadcast %30 : vector<1x16x1xf32> to vector<1x16x8xf32>
    %32 = arith.mulf %27, %31 : vector<1x16x8xf32>
    "tpu.trace_start"() <{level = 10 : i32, message = "bqk,bkc->bqc"}> : () -> ()
    %cst_15 = arith.constant dense<0.000000e+00> : vector<1x16x128xf32>
    %33 = tpu.matmul %32, %21, %cst_15 {dimension_numbers = #tpu.dot_dimension_numbers<[2], [1], [1], [2], [0, 0, 0, 1, 1, 2], [0], [0]>} : vector<1x16x8xf32>, vector<1x8x128xf32>, vector<1x16x128xf32> -> vector<1x16x128xf32>
    "tpu.trace_stop"() : () -> ()
    "tpu.trace_start"() <{level = 10 : i32, message = "bqc,bkc->bqk"}> : () -> ()
    %cst_16 = arith.constant dense<0.000000e+00> : vector<1x8x16xf32>
    %34 = tpu.matmul %19, %17, %cst_16 {dimension_numbers = #tpu.dot_dimension_numbers<[2], [2], [1], [1], [0, 0, 0, 1, 1, 1], [0], [0]>} : vector<1x8x128xf32>, vector<1x16x128xf32>, vector<1x8x16xf32> -> vector<1x8x16xf32>
    "tpu.trace_stop"() : () -> ()
    %cst_17 = arith.constant dense<0xFF800000> : vector<1x8xf32>
    %35 = vector.multi_reduction <maximumf>, %34, %cst_17 [2] : vector<1x8x16xf32> to vector<1x8xf32>
    %36 = vector.shape_cast %35 : vector<1x8xf32> to vector<1x8x1xf32>
    %37 = vector.broadcast %36 : vector<1x8x1xf32> to vector<1x8x16xf32>
    %38 = arith.subf %34, %37 : vector<1x8x16xf32>
    %39 = math.exp %38 : vector<1x8x16xf32>
    %cst_18 = arith.constant dense<0.000000e+00> : vector<1x8xf32>
    %40 = vector.multi_reduction <add>, %39, %cst_18 [2] : vector<1x8x16xf32> to vector<1x8xf32>
    %41 = vector.shape_cast %40 : vector<1x8xf32> to vector<1x8x1xf32>
    %42 = tpu.reciprocal %41 : vector<1x8x1xf32> -> vector<1x8x1xf32>
    %43 = vector.broadcast %42 : vector<1x8x1xf32> to vector<1x8x16xf32>
    %44 = arith.mulf %39, %43 : vector<1x8x16xf32>
    "tpu.trace_start"() <{level = 10 : i32, message = "bqk,bkc->bqc"}> : () -> ()
    %cst_19 = arith.constant dense<0.000000e+00> : vector<1x8x128xf32>
    %45 = tpu.matmul %44, %18, %cst_19 {dimension_numbers = #tpu.dot_dimension_numbers<[2], [1], [1], [2], [0, 0, 0, 1, 1, 2], [0], [0]>} : vector<1x8x16xf32>, vector<1x16x128xf32>, vector<1x8x128xf32> -> vector<1x8x128xf32>
    "tpu.trace_stop"() : () -> ()
    %46 = vector.shape_cast %33 : vector<1x16x128xf32> to vector<16x128xf32>
    %47 = vector.shape_cast %45 : vector<1x8x128xf32> to vector<8x128xf32>
    %c0_20 = arith.constant 0 : index
    %c384 = arith.constant 384 : index
    %48 = vector.load %arg3[%c0_20, %c384] : memref<160x640xf32, #tpu.memory_space<vmem>>, vector<32x32xf32>
    %cst_21 = arith.constant dense<0.000000e+00> : vector<16x32xf32>
    %49 = tpu.matmul %2, %48, %cst_21 {dimension_numbers = #tpu.dot_dimension_numbers<[1], [0], [0], [1], [0, 0, 1, 1], [], []>} : vector<16x32xf32>, vector<32x32xf32>, vector<16x32xf32> -> vector<16x32xf32>
    %c32_22 = arith.constant 32 : index
    %c384_23 = arith.constant 384 : index
    %50 = vector.load %arg3[%c32_22, %c384_23] : memref<160x640xf32, #tpu.memory_space<vmem>>, vector<128x32xf32>
    %cst_24 = arith.constant dense<0.000000e+00> : vector<16x32xf32>
    %51 = tpu.matmul %46, %50, %cst_24 {dimension_numbers = #tpu.dot_dimension_numbers<[1], [0], [0], [1], [0, 0, 1, 1], [], []>} : vector<16x128xf32>, vector<128x32xf32>, vector<16x32xf32> -> vector<16x32xf32>
    %52 = arith.addf %49, %51 : vector<16x32xf32>
    %c2 = arith.constant 2 : index
    %c0_25 = arith.constant 0 : index
    %53 = vector.load %arg4[%c2, %c0_25] : memref<4x384xf32, #tpu.memory_space<vmem>>, vector<1x32xf32>
    %54 = vector.broadcast %53 : vector<1x32xf32> to vector<16x32xf32>
    %55 = arith.addf %52, %54 : vector<16x32xf32>
    %c0_26 = arith.constant 0 : index
    %c512 = arith.constant 512 : index
    %56 = vector.load %arg3[%c0_26, %c512] : memref<160x640xf32, #tpu.memory_space<vmem>>, vector<32x32xf32>
    %cst_27 = arith.constant dense<0.000000e+00> : vector<8x32xf32>
    %57 = tpu.matmul %3, %56, %cst_27 {dimension_numbers = #tpu.dot_dimension_numbers<[1], [0], [0], [1], [0, 0, 1, 1], [], []>} : vector<8x32xf32>, vector<32x32xf32>, vector<8x32xf32> -> vector<8x32xf32>
    %c32_28 = arith.constant 32 : index
    %c512_29 = arith.constant 512 : index
    %58 = vector.load %arg3[%c32_28, %c512_29] : memref<160x640xf32, #tpu.memory_space<vmem>>, vector<128x32xf32>
    %cst_30 = arith.constant dense<0.000000e+00> : vector<8x32xf32>
    %59 = tpu.matmul %47, %58, %cst_30 {dimension_numbers = #tpu.dot_dimension_numbers<[1], [0], [0], [1], [0, 0, 1, 1], [], []>} : vector<8x128xf32>, vector<128x32xf32>, vector<8x32xf32> -> vector<8x32xf32>
    %60 = arith.addf %57, %59 : vector<8x32xf32>
    %c3 = arith.constant 3 : index
    %c0_31 = arith.constant 0 : index
    %61 = vector.load %arg4[%c3, %c0_31] : memref<4x384xf32, #tpu.memory_space<vmem>>, vector<1x32xf32>
    %62 = vector.broadcast %61 : vector<1x32xf32> to vector<8x32xf32>
    %63 = arith.addf %60, %62 : vector<8x32xf32>
    %64 = vector.shape_cast %55 : vector<16x32xf32> to vector<1x16x32xf32>
    %c0_32 = arith.constant 0 : index
    %c0_33 = arith.constant 0 : index
    %c0_34 = arith.constant 0 : index
    %65 = vector.load %arg5[%c0_32, %c0_33, %c0_34] : memref<1x16x32xf32, #tpu.memory_space<vmem>>, vector<1x16x32xf32>
    tpu.vector_store %arg5[%c0_32, %c0_33, %c0_34], %64 {strides = array<i32>} : memref<1x16x32xf32, #tpu.memory_space<vmem>>, vector<1x16x32xf32>,
    %66 = vector.shape_cast %63 : vector<8x32xf32> to vector<1x8x32xf32>
    %c0_35 = arith.constant 0 : index
    %c0_36 = arith.constant 0 : index
    %c0_37 = arith.constant 0 : index
    %67 = vector.load %arg6[%c0_35, %c0_36, %c0_37] : memref<1x8x32xf32, #tpu.memory_space<vmem>>, vector<1x8x32xf32>
    tpu.vector_store %arg6[%c0_35, %c0_36, %c0_37], %66 {strides = array<i32>} : memref<1x8x32xf32, #tpu.memory_space<vmem>>, vector<1x8x32xf32>,
    return
  }
  func.func @transform_0(%arg0: i32) -> (i32, i32, i32) {
    %c0_i32 = arith.constant 0 : i32
    %c0_i32_0 = arith.constant 0 : i32
    %c0_i32_1 = arith.constant 0 : i32
    return %arg0, %c0_i32, %c0_i32_0 : i32, i32, i32
  }
  func.func @transform_1(%arg0: i32) -> (i32, i32, i32) {
    %c0_i32 = arith.constant 0 : i32
    %c0_i32_0 = arith.constant 0 : i32
    %c0_i32_1 = arith.constant 0 : i32
    return %arg0, %c0_i32, %c0_i32_0 : i32, i32, i32
  }
  func.func @transform_2(%arg0: i32) -> (i32, i32) {
    %c0_i32 = arith.constant 0 : i32
    %c0_i32_0 = arith.constant 0 : i32
    %c0_i32_1 = arith.constant 0 : i32
    return %c0_i32, %c0_i32_0 : i32, i32
  }
  func.func @transform_3(%arg0: i32) -> (i32, i32) {
    %c0_i32 = arith.constant 0 : i32
    %c0_i32_0 = arith.constant 0 : i32
    %c0_i32_1 = arith.constant 0 : i32
    return %c0_i32, %c0_i32_0 : i32, i32
  }
  func.func @transform_4(%arg0: i32) -> (i32, i32, i32) {
    %c0_i32 = arith.constant 0 : i32
    %c0_i32_0 = arith.constant 0 : i32
    %c0_i32_1 = arith.constant 0 : i32
    return %arg0, %c0_i32, %c0_i32_0 : i32, i32, i32
  }
  func.func @transform_5(%arg0: i32) -> (i32, i32, i32) {
    %c0_i32 = arith.constant 0 : i32
    %c0_i32_0 = arith.constant 0 : i32
    %c0_i32_1 = arith.constant 0 : i32
    return %arg0, %c0_i32, %c0_i32_0 : i32, i32, i32
  }
}

</mosaic_0001>

<bundles_post_ra>
// kernel: tpu_custom_call.1
= control target key start
LH: loop header
LB: loop body
LE: loop exit
PB: predicated region body
PF: predicated region fallthrough
CT: control target
= control target key end

     0   :  { %s2689_s0 = inlined_call_operand.hbm [shape: f32[2,16,32], index: 0, kind: input, shape index: {}]   ;;  %s2690_s1 = inlined_call_operand.hbm [shape: f32[2,8,32], index: 1, kind: input, shape index: {}]   ;;  %s2691_s2 = inlined_call_operand.hbm [shape: f32[160,640], index: 2, kind: input, shape index: {}]   ;;  %s2692_s3 = inlined_call_operand.hbm [shape: f32[4,384], index: 3, kind: input, shape index: {}]   ;;  %s2693_s4 = inlined_call_operand.hbm [shape: f32[2,16,32], index: 4, kind: output, shape index: {0}]   ;;  %s2694_s5 = inlined_call_operand.hbm [shape: f32[2,8,32], index: 5, kind: output, shape index: {1}]  }
   0x1   :  { %2699 = sst [smem:[#allocation19_spill]] %s2689_s0 }
   0x2   :  { %2700 = sst [smem:[#allocation20_spill]] %s2691_s2 }
   0x3   :  { %2701 = sst [smem:[#allocation21_spill]] %s2692_s3 }
   0x4   :  { %11 = vsyncpa [#allocation3], 0 }
   0x5   :  { %13 = vsyncpa [#allocation3 + $0x1], 0 }
   0x6   :  { %14 = vsyncpa [#allocation6], 0 }
   0x7   :  { %16 = vsyncpa [#allocation6 + $0x1], 0 }
   0x8   :  { %17 = vsyncpa [#allocation9], 0 }
   0x9   :  { %18 = vsyncpa [#allocation4], 0 }
   0xa   :  { %20 = vsyncpa [#allocation4 + $0x1], 0 }
   0xb   :  { %21 = vsyncpa [#allocation12], 0 }
   0xc   :  { %23 = vsyncpa [#allocation12 + $0x1], 0  ;;  %s2268_s18 = smov 0   ;;  %s2270_s19 = smov 0  }
   0xd   :  { %s2272_s20 = smov 0   ;;  %s2274_s21 = smov 0  }
   0xe LB: > { %s2289_s22 = sadd.s32 4294967295, %s2221_s21   ;;  %s1542_s23 = sadd.s32 4294967294, %s2221_s21   ;;  %s2221_s21 = sphi %s2274_s21, %s2725_s21   ;;  %s2217_s20 = sphi %s2272_s20, %s2724_s20   ;;  %s2213_s19 = sphi %s2270_s19, %s2723_s19   ;;  %s2209_s18 = sphi %s2268_s18, %s2722_s18  }
   0xf   : > { %p49_p0 = scmp.ne.s32.totalorder %s2213_s19, %s2209_s18  ;;  %p2695_p1 = scmp.eq.s32.totalorder %s2289_s22, 0 }
  0x10   : > { %p147_p3 = scmp.eq.s32.totalorder %s1542_s23, 1  ;;  %p1543_p5 = scmp.ge.s32.totalorder %s2221_s21, 1 }
  0x11   : > { %p2298_p4 = por %p2695_p1, %p49_p0  ;;  %p180_p7 = scmp.lt.s32.totalorder %s2221_s21, 3 }
  0x12   : > { %p2303_p6 = por %p147_p3, %p49_p0  ;;  %s2223_s27 = smov [#allocation7]  }
  0x13   : > { %s2702_s24 = scalar_select %p2298_p4, 1, 0 }
  0x14   : > { %s2703_s25 = scalar_select %p2303_p6, 1, 0 }
  0x15   : > { %p2308_p8 = pnand %p1543_p5, %p180_p7  ;;  %s192_s28 = sshll.u32 %s2223_s27, 4  ;;  %s2312_s28 = int_to_ptr.vmem [resolvable:$true] %s192_s28 }
  0x16   : > { %s2224_s30 = smov [#allocation8]   ;;  %s2706_s2 = sld [smem:[#allocation20_spill]] }
  0x17   : > { %s2704_s26 = scalar_select %p2308_p8, 1, 0 }
  0x18   : > { %p1913_p9 = pneg %p2308_p8  ;;  %s206_s6 = sshll.u32 %s2224_s30, 4  ;;  %s2323_s6 = int_to_ptr.vmem [resolvable:$true] %s206_s6 }
  0x1a   : > { %p2319_p11 = pnand %p1913_p9, %p2695_p1 }
  0x1c   : > { %s1995_s9 = scalar_lea.hbm %s2706_s2, 12800  ;;  %p1997_p13 = pneg %p2319_p11 }
  0x1d   : > { %p1996_p12 = scmp.ne.s32.totalorder %s2706_s2, %s1995_s9  ;;  %p2002_p5 = scmp.lt.u32.totalorder %s1995_s9, %s2706_s2 }
  0x1f   : > { %p1998_p0 = pnand %p1997_p13, %p1996_p12 }
  0x21   : > { %p1999_p3 = pneg %p1998_p0 }
  0x23   : > { %p2004_p7 = pnand %p2002_p5, %p1999_p3 }
  0x25   : > { %2007 = shalt.err (!%p2004_p7)
}
  0x26   : > { %s2008_s14 = scalar_lea.vmem %s2312_s28, 12800  ;;  %p2016_p2 = scmp.lt.s32.totalorder %s2312_s28, %s2312_s28 }
  0x27   : > { %p2009_p9 = scmp.ne.s32.totalorder %s2312_s28, %s2008_s14  ;;  %p2017_p12 = scmp.lt.s32.totalorder %s2008_s14, %s2008_s14 }
  0x29   : > { %p2011_p10 = pnand %p2009_p9, %p1997_p13  ;;  %p2018_p0 = por %p2017_p12, %p2016_p2 }
  0x2b   : > { %p2012_p1 = pneg %p2011_p10 }
  0x2d   : > { %p2019_p6 = pnand %p2018_p0, %p2012_p1 }
  0x2f   : > { %2022 = shalt.err (!%p2019_p6)
}
  0x30   : > { %s2225_s15 = smov 640   ;;  %s2226_s16 = smov 40  }
  0x31   : > { %1916 = dma.hbm_to_vmem [thread:$0]  (!%p2319_p11), %s2706_s2, 12800, %s2312_s28, [#allocation6], %s2225_s15, %s2225_s15, %s2226_s16  }
  0x32   : > { %s2707_s3 = sld [smem:[#allocation21_spill]] }
  0x38   : > { %s2023_s7 = scalar_lea.hbm %s2707_s3, 192 }
  0x39   : > { %p2024_p2 = scmp.ne.s32.totalorder %s2707_s3, %s2023_s7  ;;  %p2030_p10 = scmp.lt.u32.totalorder %s2023_s7, %s2707_s3 }
  0x3b   : > { %p2026_p1 = pnand %p2024_p2, %p1997_p13 }
  0x3d   : > { %p2027_p6 = pneg %p2026_p1 }
  0x3f   : > { %p2032_p3 = pnand %p2030_p10, %p2027_p6 }
  0x41   : > { %2035 = shalt.err (!%p2032_p3)
}
  0x42   : > { %s2036_s28 = scalar_lea.vmem %s2323_s6, 192  ;;  %p2044_p12 = scmp.lt.s32.totalorder %s2323_s6, %s2323_s6 }
  0x43   : > { %p2037_p5 = scmp.ne.s32.totalorder %s2323_s6, %s2036_s28  ;;  %p2045_p0 = scmp.lt.s32.totalorder %s2036_s28, %s2036_s28 }
  0x45   : > { %p2039_p7 = pnand %p2037_p5, %p1997_p13  ;;  %p2046_p2 = por %p2045_p0, %p2044_p12 }
  0x47   : > { %p2040_p9 = pneg %p2039_p7 }
  0x49   : > { %p2047_p1 = pnand %p2046_p2, %p2040_p9 }
  0x4b   : > { %2050 = shalt.err (!%p2047_p1)
}
  0x4c   : > { %1919 = dma.hbm_to_vmem [thread:$0]  (!%p2319_p11), %s2707_s3, 192, %s2323_s6, [#allocation9]  }
  0x4d   : > { %s2378_s14 = sadd.s32 1, %s2221_s21   ;;  %s36_s29 = sadd.s32 1, %s2217_s20 }
  0x4e   : > { %s33_s15 = ssub.s32 %s2221_s21, %s2378_s14  ;;  %p43_p13 = scmp.ne.s32.totalorder %s2217_s20, %s2213_s19 }
  0x4f   : > { %p34_p6 = scmp.eq.s32.totalorder %s33_s15, 0  ;;  %p44_p10 = scmp.eq.s32.totalorder %s2221_s21, 0 }
  0x50   : > { %p2708_p3 = scmp.eq.s32.totalorder %s2289_s22, 1  ;;  %p1936_p7 = scmp.lt.s32.totalorder %s2221_s21, 2 }
  0x51   : > { %s2394_s17 = scalar_select %p34_p6, %s2217_s20, %s36_s29  }
  0x52   : > { %p2388_p5 = por %p2708_p3, %p43_p13  ;;  %p45_p9 = por %p44_p10, %p43_p13 }
  0x53   : > { %s2397_s23 = sand.u32 1, %s2217_s20   ;;  %s1580_s27 = sshll.u32 %s2221_s21, 8 }
  0x54   : > { %s2709_s16 = scalar_select %p2388_p5, 1, 0 }
  0x55   : > { %s1547_s6 = sshll.u32 %s2397_s23, 4  ;;  %s2710_s0 = sld [smem:[#allocation19_spill]] }
  0x56   : > { %s221_s9 = scalar_lea.vmem [#allocation2], %s1547_s6  ;;  %p2408_p11 = pnand %p1936_p7, %p45_p9 }
  0x57   : > { %s228_s10 = sshll.u32 %s221_s9, 4  ;;  %s218_s12 = scalar_lea.sflag [#allocation3], %s2397_s23  ;;  %s2406_s10 = int_to_ptr.vmem [resolvable:$true] %s228_s10 }
  0x58   : > { %p2053_p0 = pneg %p2408_p11 }
  0x5b   : > { %s2404_s8 = scalar_lea.hbm %s2710_s0, %s1580_s27  ;;  %s2056_s6 = scalar_lea.hbm %s2710_s0, 512 }
  0x5c   : > { %s2051_s13 = scalar_lea.hbm %s2404_s8, 256  ;;  %p2057_p13 = scmp.lt.u32.totalorder %s2404_s8, %s2710_s0 }
  0x5d   : > { %p2052_p12 = scmp.ne.s32.totalorder %s2404_s8, %s2051_s13  ;;  %p2058_p6 = scmp.lt.u32.totalorder %s2056_s6, %s2051_s13 }
  0x5e   : > { %p2060_p3 = scmp.lt.u32.totalorder %s2051_s13, %s2404_s8 }
  0x5f   : > { %p2054_p2 = pnand %p2053_p0, %p2052_p12  ;;  %p2059_p10 = por %p2058_p6, %p2057_p13 }
  0x61   : > { %p2055_p1 = pneg %p2054_p2  ;;  %p2061_p7 = por %p2060_p3, %p2059_p10 }
  0x63   : > { %p2062_p9 = pnand %p2061_p7, %p2055_p1 }
  0x65   : > { %2065 = shalt.err (!%p2062_p9)
}
  0x66   : > { %s2066_s7 = scalar_lea.vmem %s2406_s10, 256  ;;  %s2227_s9 = smov [#allocation2]  }
  0x67   : > { %p2067_p12 = scmp.ne.s32.totalorder %s2406_s10, %s2066_s7  ;;  %s2071_s29 = sshll.u32 %s2227_s9, 4  ;;  %s2072_s29 = int_to_ptr.vmem [resolvable:$false] %s2071_s29 }
  0x68   : > { %s2073_s15 = scalar_lea.vmem %s2072_s29, 512  ;;  %p2074_p4 = scmp.lt.s32.totalorder %s2406_s10, %s2072_s29 }
  0x69   : > { %p2069_p2 = pnand %p2067_p12, %p2053_p0  ;;  %p2075_p13 = scmp.lt.s32.totalorder %s2073_s15, %s2066_s7 }
  0x6b   : > { %p2070_p5 = pneg %p2069_p2  ;;  %p2076_p6 = por %p2075_p13, %p2074_p4 }
  0x6d   : > { %p2077_p10 = pnand %p2076_p6, %p2070_p5 }
  0x6f   : > { %2080 = shalt.err (!%p2077_p10)
}
  0x70   : > { %s2228_s13 = smov 128   ;;  %s2229_s6 = smov 8  }
  0x71   : > { %1923 = dma.hbm_to_vmem [thread:$0]  (!%p2408_p11), %s2404_s8, 256, %s2406_s10, %s218_s12, %s2228_s13, %s2228_s13, %s2229_s6  }
  0x72   : > { %s1550_s27 = sshll.u32 %s2397_s23, 3  ;;  %s1551_s30 = sshll.u32 %s2221_s21, 7 }
  0x73   : > { %s2446_s29 = scalar_lea.hbm %s2690_s1, %s1551_s30  ;;  %s242_s15 = scalar_lea.vmem [#allocation5], %s1550_s27 }
  0x74   : > { %s249_s28 = sshll.u32 %s242_s15, 4  ;;  %s2712_s0 = sand.u32 1, %s2221_s21   ;;  %s250_s28 = int_to_ptr.vmem [resolvable:$true] %s249_s28 }
  0x75   : > { %s239_s2 = scalar_lea.sflag [#allocation6], %s2712_s0  ;;  %s2081_s3 = scalar_lea.hbm %s2446_s29, 128 }
  0x76   : > { %p2082_p4 = scmp.ne.s32.totalorder %s2446_s29, %s2081_s3  ;;  %s2086_s10 = scalar_lea.hbm %s2690_s1, 256 }
  0x77   : > { %p2087_p3 = scmp.lt.u32.totalorder %s2446_s29, %s2690_s1  ;;  %p2088_p7 = scmp.lt.u32.totalorder %s2086_s10, %s2081_s3 }
  0x78   : > { %p2084_p5 = pnand %p2082_p4, %p2053_p0  ;;  %p2090_p12 = scmp.lt.u32.totalorder %s2081_s3, %s2446_s29 }
  0x79   : > { %p2089_p9 = por %p2088_p7, %p2087_p3 }
  0x7a   : > { %p2085_p1 = pneg %p2084_p5 }
  0x7b   : > { %p2091_p2 = por %p2090_p12, %p2089_p9 }
  0x7d   : > { %p2092_p13 = pnand %p2091_p2, %p2085_p1 }
  0x7f   : > { %2095 = shalt.err (!%p2092_p13)
}
  0x80   : > { %s2096_s0 = scalar_lea.vmem %s250_s28, 128  ;;  %s2230_s6 = smov [#allocation5]  }
  0x81   : > { %p2097_p6 = scmp.ne.s32.totalorder %s250_s28, %s2096_s0  ;;  %s2101_s27 = sshll.u32 %s2230_s6, 4  ;;  %s2102_s27 = int_to_ptr.vmem [resolvable:$false] %s2101_s27 }
  0x82   : > { %s2103_s30 = scalar_lea.vmem %s2102_s27, 256  ;;  %p2104_p5 = scmp.lt.s32.totalorder %s250_s28, %s2102_s27 }
  0x83   : > { %p2099_p10 = pnand %p2097_p6, %p2053_p0  ;;  %p2105_p8 = scmp.lt.s32.totalorder %s2103_s30, %s2096_s0 }
  0x85   : > { %p2100_p4 = pneg %p2099_p10  ;;  %p2106_p3 = por %p2105_p8, %p2104_p5 }
  0x87   : > { %p2107_p7 = pnand %p2106_p3, %p2100_p4 }
  0x89   : > { %2110 = shalt.err (!%p2107_p7)
}
  0x8a   : > { %1926 = dma.hbm_to_vmem [thread:$0]  (!%p2408_p11), %s2446_s29, 128, %s250_s28, %s239_s2  }
  0x8b   : > { %p2713_p1 = scmp.ne.s32.totalorder %s2704_s26, 0 }
  0x8c   : > { %s2472_s3 = sand.u32 (!%p2713_p1), 1, %s2213_s19   ;;  %p2714_p8 = scmp.ne.s32.totalorder (!%p2713_p1), %s2702_s24, 0 }
  0x8d   : > { %258 = sbr.rel (%p2713_p1) target bundleno = 1404 (0x57c), region = 36  ;;  %s1553_s9 = sshll.u32 (!%p2713_p1), %s2472_s3, 4 }
  0x8e   : > { %s261_s7 = scalar_lea.sflag (!%p2713_p1), [#allocation3], %s2472_s3  ;;  %s2478_s15 = scalar_lea.vmem (!%p2713_p1), [#allocation2], %s1553_s9 }
  0x94   : > { %2184 = dma.done.wait (%p2714_p8), %s261_s7, 256  }
  0x95   : > { %2186 = vsyncadd (%p2714_p8), %s261_s7, 4294967040  ;;  %s269_s2 = sand.u32 1, %s2289_s22   ;;  %s1554_s26 = sshll.u32 %s2472_s3, 3 }
  0x96   : > { %s270_s11 = scalar_lea.sflag [#allocation6], %s269_s2  ;;  %s2488_s28 = scalar_lea.vmem [#allocation5], %s1554_s26 }
  0x97   : > { %2188 = dma.done.wait (%p2714_p8), %s270_s11, 128  }
  0x98   : > { %2190 = vsyncadd (%p2714_p8), %s270_s11, 4294967168  ;;  %p2715_p11 = scmp.eq.s32.totalorder %s2289_s22, 0 }
  0x9a   : > { %2192 = dma.done.wait (%p2715_p11), [#allocation6], 12800   ;;  %p2716_p0 = pmov %p2715_p11 }
  0x9c   : > { %2194 = vsyncadd (%p2716_p0), [#allocation6], 4294954496  ;;  %p2717_p9 = pmov %p2716_p0 }
  0x9d   : > { %p2718_p12 = pmov %p2716_p0 }
  0x9e   : > { %2196 = dma.done.wait (%p2717_p9), [#allocation9], 192  }
  0x9f   : > { %2198 = vsyncadd (%p2718_p12), [#allocation9], 4294967104  ;;  %v2231_v0 = vmov 0.0   ;;  %v322_v1 = vld [vmem:[#allocation7 + $0x8] sm:$0xff]  ;;  %v325_v2 = vld [vmem:[#allocation7 + $0x30] sm:$0xff]  ;;  %vm350_vm0 = vcmask 261120   ;;  %v335_v28 = vlaneseq }
  0xa0   : > { %421 = vmatprep.mubr.f32.mxu0 %v2231_v0  ;;  %v321_v3 = vld [vmem:[#allocation7] sm:$0xff]  ;;  %v1789_v4 = vpack.c.bf16 %v325_v2, %v322_v1  ;;  %v324_v5 = vld [vmem:[#allocation7 + $0x28] sm:$0xff]  ;;  %v328_v6 = vld [vmem:[#allocation7 + $0x58] sm:$0xff]  ;;  %v2232_v49 = vmov 0.0|0.0   ;;  %vm2233_vm1 = vmmov 0   ;;  %vm758_vm2 = vcmask 64512  }
  0xa1   : > { %v331_v7 = vld [vmem:[#allocation7 + $0x80] sm:$0xff]  ;;  %v1791_v8 = vpack.c.bf16 %v324_v5, %v321_v3  ;;  %v327_v10 = vld [vmem:[#allocation7 + $0x50] sm:$0xff]  ;;  %v330_v11 = vld [vmem:[#allocation7 + $0x78] sm:$0xff]  ;;  %v2522_v29 = vshrl.u32 %v335_v28, 7  ;;  %vm932_vm3 = vcmask 130048   ;;  %s310_s24 = scalar_lea.vmem [#allocation10], %s1553_s9 }
  0xa2   : > { %v1793_v9 = vpack.c.bf16 %v331_v7, %v328_v6  ;;  %v2504_v12 = vld [vmem:[%s2478_s15] sm:$0xff]  ;;  %1790 = vmatprep.subr.bf16.mxu0 %v1789_v4  ;;  %v510_v13 = vld [vmem:[#allocation7 + $0xa8] sm:$0xff]  ;;  %v1795_v15 = vpack.c.bf16 %v330_v11, %v327_v10  ;;  %v516_v19 = vld [vmem:[#allocation7 + $0xf8] sm:$0xff]  ;;  %s1382_s29 = sshll.u32 %s310_s24, 4  ;;  %s1581_s23 = sshll.u32 %s2289_s22, 8  ;;  %s2601_s29 = int_to_ptr.vmem [resolvable:$true] %s1382_s29 }
  0xa3   : > { %v513_v14 = vld [vmem:[#allocation7 + $0xd0] sm:$0xff]  ;;  %1659 = vmatprep.mubr.msk.f32.mxu1 %vm350_vm0, %v2504_v12  ;;  %1792 = vmatpush1.bf16.msra.mxu0 %v1791_v8  ;;  %v509_v17 = vld [vmem:[#allocation7 + $0xa0] sm:$0xff]  ;;  %v512_v18 = vld [vmem:[#allocation7 + $0xc8] sm:$0xff]  ;;  %v337_v30 = vsub.s32 0, %v2522_v29  ;;  %v341_v33 = vsub.s32 1, %v2522_v29  ;;  %s2606_s12 = scalar_lea.hbm %s2693_s4, %s1581_s23  ;;  %s1577_s13 = sshll.u32 %s2289_s22, 7 }
  0xa4   : > { %1794 = vmatprep.subr.bf16.mxu0 %v1793_v9  ;;  %v1805_v16 = vpack.c.bf16 %v513_v14, %v510_v13  ;;  %v519_v20 = vld [vmem:[#allocation7 + $0x120] sm:$0xff]  ;;  %v1807_v21 = vpack.c.bf16 %v512_v18, %v509_v17  ;;  %v515_v23 = vld [vmem:[#allocation7 + $0xf0] sm:$0xff]  ;;  %v518_v24 = vld [vmem:[#allocation7 + $0x118] sm:$0xff]  ;;  %s2611_s0 = scalar_lea.vmem [#allocation11], %s1554_s26  ;;  %s2619_s22 = scalar_lea.hbm %s2694_s5, %s1577_s13 }
  0xa5   : > { %v1809_v22 = vpack.c.bf16 %v519_v20, %v516_v19  ;;  %v2512_v25 = vld [vmem:[%s2478_s15 + $0x8] sm:$0xff]  ;;  %v1811_v26 = vpack.c.bf16 %v518_v24, %v515_v23  ;;  %v2518_v27 = vld [vmem:[%s2488_s28] sm:$0xff]  ;;  %v329_v54 = vld [vmem:[#allocation7 + $0x60] sm:$0xff]  ;;  %v345_v24 = vsub.s32 2, %v2522_v29  ;;  %s1398_s6 = sshll.u32 %s2611_s0, 4  ;;  %s1364_s9 = scalar_lea.sflag [#allocation4], %s2472_s3  ;;  %s2621_s6 = int_to_ptr.vmem [resolvable:$true] %s1398_s6 }
  0xa6   : > { %v2525_v31 = vld [vmem:[#allocation8] ss:$4 sm:$0x7]  ;;  %v2530_v38 = vld [vmem:[#allocation8 + $0x1] ss:$4 sm:$0x7] }
  0xa7   : > { %1796 = vmatpush1.bf16.msra.mxu0 %v1795_v15  ;;  %v338_v32 = vrot.slane %v2525_v31, %v337_v30  ;;  %v342_v37 = vrot.slane %v2525_v31, %v341_v33  ;;  %v531_v43 = vrot.slane %v2530_v38, %v341_v33  ;;  %v527_v50 = vrot.slane %v2530_v38, %v337_v30  ;;  %v323_v52 = vld [vmem:[#allocation7 + $0x10] sm:$0xff]  ;;  %v326_v53 = vld [vmem:[#allocation7 + $0x38] sm:$0xff]  ;;  %v332_v56 = vld [vmem:[#allocation7 + $0x88] sm:$0xff]  ;;  %s2111_s7 = scalar_lea.vmem %s2601_s29, 256  ;;  %p2719_p13 = scmp.ne.s32.totalorder %s2709_s16, 0 }
  0xa8   : > { %1806 = vmatprep.subr.bf16.mxu0 %v1805_v16  ;;  %v1797_v55 = vpack.c.bf16 %v326_v53, %v323_v52  ;;  %v1801_v57 = vpack.c.bf16 %v332_v56, %v329_v54  ;;  %v511_v58 = vld [vmem:[#allocation7 + $0xb0] sm:$0xff]  ;;  %v514_v59 = vld [vmem:[#allocation7 + $0xd8] sm:$0xff]  ;;  %v517_v61 = vld [vmem:[#allocation7 + $0x100] sm:$0xff]  ;;  %v346_v30 = vrot.slane %v2525_v31, %v345_v24  ;;  %p2112_p2 = scmp.ne.s32.totalorder %s2601_s29, %s2111_s7  ;;  %s2234_s15 = smov [#allocation10]  }
  0xa9   : > { %v1814_v60 = vpack.c.bf16 %v514_v59, %v511_v58  ;;  %v520_v62 = vld [vmem:[#allocation7 + $0x128] sm:$0xff]  ;;  %v1198_v29 = vld [vmem:[#allocation7 + $0xc0] sm:$0xff]  ;;  %v1200_v31 = vld [vmem:[#allocation7 + $0x110] sm:$0xff]  ;;  %s2115_s2 = sshll.u32 %s2234_s15, 4  ;;  %s2116_s2 = int_to_ptr.vmem [resolvable:$false] %s2115_s2 }
  0xaa   : > { %1559 = vmatmul.mubr.msk.f32.vlgmr.msra.gmra.mrb[0].mxu0 %vm350_vm0, %v2504_v12  ;;  %1798 = vmatprep.subr.bf16.mxu1 %v1797_v55  ;;  %v1817_v63 = vpack.c.bf16 %v520_v62, %v517_v61  ;;  %v1208_v53 = vld [vmem:[#allocation7 + $0x250] sm:$0xff]  ;;  %v1209_v54 = vld [vmem:[#allocation7 + $0x278] sm:$0xff]  ;;  %v1210_v56 = vld [vmem:[#allocation7 + $0x2a0] sm:$0xff]  ;;  %p2113_p6 = pnand %p2112_p2, %p2719_p13  ;;  %s2117_s26 = scalar_lea.vmem %s2116_s2, 512 }
  0xab   : > { %1808 = vmatpush1.bf16.msra.mxu0 %v1807_v21  ;;  %427 = vmatprep.mubr.f32.mxu0 %v2231_v0  ;;  %p2118_p4 = scmp.lt.s32.totalorder %s2601_s29, %s2116_s2  ;;  %p2119_p5 = scmp.lt.s32.totalorder %s2117_s26, %s2111_s7 }
  0xac   : > { %1810 = vmatprep.subr.bf16.mxu0 %v1809_v22  ;;  %1800 = vmatpush3.bf16.msra.mxu1 %v1797_v55  ;;  %v1881_v55 = vpack.c.bf16 %v1209_v54, %v1208_v53  ;;  %v1570_v53 = vld [vmem:[#allocation8 + $0x2] ss:$0 sm:$0xff]  ;;  %p2114_p10 = pneg %p2113_p6 }
  0xad   : > { %1802 = vmatprep.subr.bf16.mxu1 %v1801_v57  ;;  %p2120_p3 = por %p2119_p5, %p2118_p4 }
  0xae   : > { %1560 = vmatmul.mubr.msk.f32.gmra.mrb[2].mxu0 %vm350_vm0, %v2512_v25 }
  0xaf   : > { %1812 = vmatpush1.bf16.msra.mxu0 %v1811_v26  ;;  %606 = vmatprep.mubr.f32.mxu0 %v2231_v0  ;;  %p2121_p7 = pnand %p2120_p3, %p2114_p10 }
  0xb0   : > { %1804 = vmatpush3.bf16.msra.mxu1 %v1801_v57  ;;  %v1211_v57 = vld [vmem:[#allocation7 + $0x2c8] sm:$0xff] }
  0xb1   : > { %1813 = vmatprep.subr.bf16.mxu1 %v2232_v49  ;;  %v1884_v58 = vpack.c.bf16 %v1211_v57, %v1210_v56 }
  0xb2   : > { %1563 = vmatmul.mubr.msk.f32.vlgmr.msra.gmra.mrb[4].mxu0 %vm350_vm0, %v2518_v27 }
  0xb3   : > { %1660 = vmatmul.mubr.msk.f32.vlgmr.msra.gmra.mrb[0].mxu1 %vm350_vm0, %v2512_v25 }
  0xb4   : > { %1815 = vmatpush3.bf16.msra.mxu1 %v1814_v60  ;;  %1670 = vmatprep.mubr.msk.f32.mxu1 %vm2233_vm1, %v2231_v0 }
  0xb5   : > { %1816 = vmatprep.subr.bf16.mxu1 %v2232_v49 }
  0xb8   : > { %1818 = vmatpush3.bf16.msra.mxu1 %v1817_v63 }
  0xbb   : > { %1671 = vmatmul.mubr.msk.f32.vlgmr.msra.gmra.mrb[2].mxu1 %vm350_vm0, %v2518_v27 }
 0x17d   : > { %v423_v34 = vpop.f32.mrb[0].mxu0 }
 0x17e   : > { %v424_v35 = vadd.f32 %v423_v34, %v338_v32  ;;  %v425_v36 = vpop.f32.mrb[1].mxu0 }
 0x17f   : > { %v426_v41 = vadd.f32 %v425_v36, %v342_v37 }
 0x180   : > { %1675 = vmatprep.mubr.f32.mxu0 %v424_v35  ;;  %v535_v35 = vrot.slane %v2530_v38, %v345_v24  ;;  %v1202_v38 = vld [vmem:[#allocation7 + $0x160] sm:$0xff]  ;;  %v1033_v24 = vld [vmem:[#allocation7 + $0x298] sm:$0xff] }
 0x181   : > { %v429_v39 = vpop.f32.mrb[2].mxu0 }
 0x182   : > { %v431_v40 = vpop.f32.mrb[3].mxu0  ;;  %v430_v48 = vadd.f32 %v429_v39, %v338_v32 }
 0x183   : > { %v432_v42 = vadd.f32 %v431_v40, %v342_v37  ;;  %v1199_v40 = vld [vmem:[#allocation7 + $0xe8] sm:$0xff] }
 0x185   : > { %v1820_v44 = vpack.c.bf16 %v432_v42, %v426_v41  ;;  %v608_v45 = vpop.f32.mrb[4].mxu0  ;;  %v1866_v41 = vpack.c.bf16 %v1199_v40, %v1198_v29  ;;  %v1201_v42 = vld [vmem:[#allocation7 + $0x138] sm:$0xff]  ;;  %v1019_v40 = vld [vmem:[#allocation7 + $0x68] sm:$0xff] }
 0x186   : > { %v610_v46 = vpop.f32.mrb[5].mxu0  ;;  %v609_v51 = vadd.f32 %v608_v45, %v527_v50  ;;  %v1661_v26 = vpop.f32.mrb[0].mxu1  ;;  %v1206_v50 = vld [vmem:[#allocation7 + $0x200] sm:$0xff] }
 0x187   : > { %v611_v47 = vadd.f32 %v610_v46, %v531_v43  ;;  %v500_v28 = vpop.f32.mrb[1].mxu1  ;;  %v2565_v32 = vadd.f32 %v1661_v26, %v346_v30  ;;  %v1869_v43 = vpack.c.bf16 %v1201_v42, %v1200_v31  ;;  %v1204_v46 = vld [vmem:[#allocation7 + $0x1b0] sm:$0xff]  ;;  %v1034_v26 = vld [vmem:[#allocation7 + $0x2c0] sm:$0xff]  ;;  %v1195_v42 = vld [vmem:[#allocation7 + $0x48] sm:$0xff] }
 0x188   : > { %v2567_v33 = vadd.f32 %v500_v28, %v346_v30  ;;  %v1849_v28 = vpack.c.bf16 %v1034_v26, %v1033_v24  ;;  %v1035_v30 = vld [vmem:[#allocation7 + $0x2e8] sm:$0xff]  ;;  %v1194_v31 = vld [vmem:[#allocation7 + $0x20] sm:$0xff] }
 0x189   : > { %1673 = vmatprep.subr.mxu0 %v611_v47 }
 0x18a   : > { %1674 = vmatpush3.xpose.msra.mxu0 %v611_v47  ;;  %v1823_v34 = vpack.c.bf16 %v2565_v32, %v2567_v33  ;;  %v1205_v47 = vld [vmem:[#allocation7 + $0x1d8] sm:$0xff]  ;;  %v1036_v32 = vld [vmem:[#allocation7 + $0x310] sm:$0xff] }
 0x18b   : > { %1819 = vmatprep.subr.bf16.mxu0 %v2232_v49  ;;  %v1853_v33 = vpack.c.bf16 %v1036_v32, %v1035_v30 }
 0x18d   : > { %1676 = vmatmul.mubr.f32.vlgmr.msra.gmra.mrb[6].mxu0 %v430_v48  ;;  %v1875_v48 = vpack.c.bf16 %v1205_v47, %v1204_v46  ;;  %v1196_v46 = vld [vmem:[#allocation7 + $0x70] sm:$0xff]  ;;  %v1197_v47 = vld [vmem:[#allocation7 + $0x98] sm:$0xff] }
 0x18e   : > { %1821 = vmatpush3.bf16.xpose.msra.mxu0 %v1820_v44  ;;  %1687 = vmatprep.mubr.msk.f32.mxu0 %vm2233_vm1, %v2231_v0  ;;  %v679_v36 = vpop.f32.mrb[2].mxu1  ;;  %v1203_v44 = vld [vmem:[#allocation7 + $0x188] sm:$0xff] }
 0x18f   : > { %1865 = vmatprep.subr.bf16.mxu0 %v2232_v49  ;;  %v680_v37 = vadd.f32 %v679_v36, %v535_v35  ;;  %v1672_v39 = vpop.f32.mrb[3].mxu1  ;;  %v1872_v45 = vpack.c.bf16 %v1203_v44, %v1202_v38  ;;  %v1213_v35 = vld [vmem:[#allocation7 + $0x318] sm:$0xff] }
 0x190   : > { %v1018_v39 = vld [vmem:[#allocation7 + $0x40] sm:$0xff] }
 0x191   : > { %1678 = vmatprep.subr.mxu1 %v680_v37 }
 0x192   : > { %1679 = vmatpush3.msra.mxu1 %v680_v37  ;;  %v1017_v37 = vld [vmem:[#allocation7 + $0x18] sm:$0xff] }
 0x193   : > { %1822 = vmatprep.subr.bf16.mxu1 %v2232_v49  ;;  %v1857_v29 = vpack.c.bf16 %v1018_v39, %v1017_v37 }
 0x195   : > { %1688 = vmatmul.mubr.f32.vlgmr.msra.gmra.mrb[8].mxu0 %v609_v51  ;;  %v1207_v51 = vld [vmem:[#allocation7 + $0x228] sm:$0xff] }
 0x196   : > { %1775 = vmatprep.mubr.msk.f32.mxu0 %vm2233_vm1, %v2231_v0  ;;  %1867 = vmatpush3.bf16.msra.mxu0 %v1866_v41  ;;  %v1878_v52 = vpack.c.bf16 %v1207_v51, %v1206_v50  ;;  %v1020_v41 = vld [vmem:[#allocation7 + $0x90] sm:$0xff]  ;;  %v1893_v51 = vpack.c.bf16 %v1197_v47, %v1196_v46 }
 0x197   : > { %1868 = vmatprep.subr.bf16.mxu0 %v2232_v49  ;;  %v1861_v44 = vpack.c.bf16 %v1020_v41, %v1019_v40 }
 0x19a   : > { %1870 = vmatpush3.bf16.msra.mxu0 %v1869_v43 }
 0x19b   : > { %1871 = vmatprep.subr.bf16.mxu0 %v2232_v49 }
 0x19e   : > { %1873 = vmatpush3.bf16.msra.mxu0 %v1872_v45  ;;  %v1890_v45 = vpack.c.bf16 %v1195_v42, %v1194_v31 }
 0x19f   : > { %1874 = vmatprep.subr.bf16.mxu0 %v2232_v49 }
 0x1a2   : > { %1876 = vmatpush3.bf16.msra.mxu0 %v1875_v48 }
 0x1a3   : > { %1877 = vmatprep.subr.bf16.mxu0 %v2232_v49 }
 0x1a6   : > { %1879 = vmatpush3.bf16.msra.mxu0 %v1878_v52 }
 0x1a7   : > { %1880 = vmatprep.subr.bf16.mxu0 %v2232_v49 }
 0x1aa   : > { %1882 = vmatpush3.bf16.msra.mxu0 %v1881_v55  ;;  %v1572_v55 = vld [vmem:[#allocation8 + $0x3] ss:$0 sm:$0xff] }
 0x1ab   : > { %1883 = vmatprep.subr.bf16.mxu0 %v2232_v49 }
 0x1ae   : > { %1885 = vmatpush3.bf16.msra.mxu0 %v1884_v58 }
 0x1af   : > { %1886 = vmatprep.subr.bf16.mxu0 %v2232_v49 }
 0x260   : > { %v1677_v1 = vpop.f32.mrb[6].mxu0 }
 0x261   : > { %v749_v2 = vpop.f32.mrb[7].mxu0  ;;  %v762_v4 = vsel %vm758_vm2, %v1677_v1, -inf }
 0x262   : > { %v759_v3 = vsel %vm758_vm2, %v749_v2, -inf }
 0x263   : > { %760 = vmax.xlane.f32.xlu0 %v759_v3 }
 0x267   : > { %763 = vmax.xlane.f32.xlu0 %v762_v4 }
 0x268   : > { %v928_v5 = vpop.f32.mrb[8].mxu0 }
 0x269   : > { %v1689_v6 = vpop.f32.mrb[9].mxu0  ;;  %v933_v7 = vsel %vm932_vm3, %v928_v5, -inf }
 0x26a   : > { %934 = vmax.xlane.f32.xlu1 %v933_v7  ;;  %v1023_v6 = vld [vmem:[#allocation7 + $0x108] sm:$0xff]  ;;  %v1024_v7 = vld [vmem:[#allocation7 + $0x130] sm:$0xff] }
 0x2f0   : > { %v761_v8 = vpop.xlane.xlu0 %760 }
 0x2f1   : > { %v765_v9 = vsub.f32 %v749_v2, %v761_v8  ;;  %v1022_v2 = vld [vmem:[#allocation7 + $0xe0] sm:$0xff] }
 0x2f3   : > { %v767_v10 = vmul.f32 1.442695, %v765_v9 }
 0x2f4   : > { %v764_v11 = vpop.xlane.xlu0 %763 }
 0x2f5   : > { %1983 = vpow2.f32 %v767_v10  ;;  %v766_v13 = vsub.f32 %v1677_v1, %v764_v11  ;;  %v1021_v1 = vld [vmem:[#allocation7 + $0xb8] sm:$0xff]  ;;  %v1829_v10 = vpack.c.bf16 %v1024_v7, %v1023_v6 }
 0x2f6   : > { %v1025_v11 = vld [vmem:[#allocation7 + $0x158] sm:$0xff] }
 0x2f7   : > { %v769_v14 = vmul.f32 1.442695, %v766_v13  ;;  %v935_v15 = vpop.xlane.xlu1 %934  ;;  %v1026_v13 = vld [vmem:[#allocation7 + $0x180] sm:$0xff] }
 0x2f8   : > { %v936_v16 = vsub.f32 %v928_v5, %v935_v15  ;;  %v1825_v5 = vpack.c.bf16 %v1022_v2, %v1021_v1  ;;  %v1027_v15 = vld [vmem:[#allocation7 + $0x1a8] sm:$0xff] }
 0x2f9   : > { %1985 = vpow2.f32 %v769_v14  ;;  %v1833_v14 = vpack.c.bf16 %v1026_v13, %v1025_v11 }
 0x2fa   : > { %v937_v17 = vmul.f32 1.442695, %v936_v16  ;;  %v1028_v16 = vld [vmem:[#allocation7 + $0x1d0] sm:$0xff] }
 0x2fc   : > { %1987 = vpow2.f32 %v937_v17  ;;  %v1837_v17 = vpack.c.bf16 %v1028_v16, %v1027_v15 }
 0x2ff   : > { %v2551_v18 = vpop.eup %1983 }
 0x300   : > { %v771_v19 = vsel %vm758_vm2, %v2551_v18, 0.0 }
 0x301   : > { %772 = vadd.xlane.f32.xlu1 %v771_v19  ;;  %v1030_v19 = vld [vmem:[#allocation7 + $0x220] sm:$0xff] }
 0x303   : > { %v2555_v20 = vpop.eup %1985 }
 0x304   : > { %v774_v21 = vsel %vm758_vm2, %v2555_v20, 0.0 }
 0x305   : > { %775 = vadd.xlane.f32.xlu0 %v774_v21  ;;  %v1031_v21 = vld [vmem:[#allocation7 + $0x248] sm:$0xff] }
 0x306   : > { %v2559_v22 = vpop.eup %1987 }
 0x307   : > { %v939_v23 = vsel %vm932_vm3, %v2559_v22, 0.0 }
 0x308   : > { %940 = vadd.xlane.f32.xlu1 %v939_v23 }
 0x38e   : > { %v773_v59 = vpop.xlane.xlu1 %772 }
 0x38f   : > { %1989 = vrcp.f32 %v773_v59 }
 0x392   : > { %v776_v60 = vpop.xlane.xlu0 %775 }
 0x393   : > { %1991 = vrcp.f32 %v776_v60 }
 0x395   : > { %v941_v61 = vpop.xlane.xlu1 %940 }
 0x396   : > { %1993 = vrcp.f32 %v941_v61 }
 0x399   : > { %v1990_v62 = vpop.eup %1989 }
 0x39a   : > { %v779_v63 = vmul.f32 %v1990_v62, %v2551_v18  ;;  %v1029_v18 = vld [vmem:[#allocation7 + $0x1f8] sm:$0xff] }
 0x39c   : > { %1680 = vmatprep.mubr.msk.f32.mxu1 %vm758_vm2, %v779_v63 }
 0x39d   : > { %v1992_v3 = vpop.eup %1991 }
 0x39e   : > { %v780_v4 = vmul.f32 %v1992_v3, %v2555_v20  ;;  %v1841_v20 = vpack.c.bf16 %v1030_v19, %v1029_v18 }
 0x3a0   : > { %v1994_v8 = vpop.eup %1993  ;;  %1681 = vmatmul.mubr.msk.f32.vlgmr.msra.gmra.mrb[4].mxu1 %vm758_vm2, %v780_v4 }
 0x3a1   : > { %v943_v9 = vmul.f32 %v1994_v8, %v2559_v22  ;;  %1824 = vmatpush3.bf16.msra.mxu1 %v1823_v34  ;;  %1694 = vmatprep.mubr.msk.f32.mxu1 %vm2233_vm1, %v2231_v0  ;;  %v1032_v22 = vld [vmem:[#allocation7 + $0x270] sm:$0xff] }
 0x3a2   : > { %1826 = vmatprep.subr.bf16.mxu1 %v1825_v5  ;;  %v1845_v23 = vpack.c.bf16 %v1032_v22, %v1031_v21  ;;  %v1212_v34 = vld [vmem:[#allocation7 + $0x2f0] sm:$0xff] }
 0x3a3   : > { %v1887_v36 = vpack.c.bf16 %v1213_v35, %v1212_v34 }
 0x3a4   : > { %1695 = vmatmul.mubr.msk.f32.vlgmr.msra.gmra.mrb[6].mxu1 %vm932_vm3, %v943_v9 }
 0x3a5   : > { %1828 = vmatpush3.bf16.msra.mxu1 %v1825_v5  ;;  %1888 = vmatpush3.bf16.msra.mxu0 %v1887_v36 }
 0x3a6   : > { %1830 = vmatprep.subr.bf16.mxu1 %v1829_v10  ;;  %1889 = vmatprep.subr.bf16.mxu0 %v2232_v49 }
 0x3a9   : > { %1832 = vmatpush3.bf16.msra.mxu1 %v1829_v10 }
 0x3aa   : > { %1834 = vmatprep.subr.bf16.mxu1 %v1833_v14 }
 0x3ad   : > { %1836 = vmatpush3.bf16.msra.mxu1 %v1833_v14 }
 0x3ae   : > { %1838 = vmatprep.subr.bf16.mxu1 %v1837_v17 }
 0x3b1   : > { %1840 = vmatpush3.bf16.msra.mxu1 %v1837_v17 }
 0x3b2   : > { %1842 = vmatprep.subr.bf16.mxu1 %v1841_v20 }
 0x3b5   : > { %1844 = vmatpush3.bf16.msra.mxu1 %v1841_v20 }
 0x3b6   : > { %1846 = vmatprep.subr.bf16.mxu1 %v1845_v23 }
 0x3b9   : > { %1848 = vmatpush3.bf16.msra.mxu1 %v1845_v23 }
 0x3ba   : > { %1850 = vmatprep.subr.bf16.mxu1 %v1849_v28 }
 0x3bd   : > { %1852 = vmatpush3.bf16.msra.mxu1 %v1849_v28 }
 0x3be   : > { %1854 = vmatprep.subr.bf16.mxu1 %v1853_v33 }
 0x3c1   : > { %1856 = vmatpush3.bf16.msra.mxu1 %v1853_v33 }
 0x3c2   : > { %1858 = vmatprep.subr.bf16.mxu1 %v1857_v29 }
 0x473   : > { %v1682_v43 = vpop.f32.mrb[4].mxu1 }
 0x474   : > { %v853_v38 = vpop.f32.mrb[5].mxu1 }
 0x475   : > { %1729 = vmatprep.mubr.f32.mxu1 %v853_v38 }
 0x476   : > { %1730 = vmatmul.mubr.f32.vlgmr.msra.gmra.mrb[8].mxu1 %v1682_v43 }
 0x477   : > { %v1013_v48 = vpop.f32.mrb[6].mxu1  ;;  %1860 = vmatpush3.bf16.msra.mxu1 %v1857_v29  ;;  %1740 = vmatprep.mubr.msk.f32.mxu1 %vm350_vm0, %v2504_v12 }
 0x478   : > { %v1696_v50 = vpop.f32.mrb[7].mxu1  ;;  %1776 = vmatmul.mubr.f32.vlgmr.msra.gmra.mrb[10].mxu0 %v1013_v48  ;;  %1862 = vmatprep.subr.bf16.mxu1 %v1861_v44 }
 0x479   : > { %1891 = vmatpush3.bf16.msra.mxu0 %v1890_v45  ;;  %1786 = vmatprep.mubr.msk.f32.mxu0 %vm2233_vm1, %v2231_v0 }
 0x47a   : > { %1892 = vmatprep.subr.bf16.mxu0 %v2232_v49 }
 0x47b   : > { %1864 = vmatpush3.bf16.msra.mxu1 %v1861_v44 }
 0x47d   : > { %1894 = vmatpush3.bf16.msra.mxu0 %v1893_v51 }
 0x47e   : > { %1741 = vmatmul.mubr.msk.f32.vlgmr.msra.gmra.mrb[8].mxu1 %vm350_vm0, %v2512_v25 }
 0x480   : > { %1787 = vmatmul.mubr.msk.f32.vlgmr.msra.gmra.mrb[12].mxu0 %vm350_vm0, %v2518_v27 }
 0x54b   : > { %v1280_v12 = vpop.f32.mrb[10].mxu0 }
 0x54c   : > { %v1777_v52 = vpop.f32.mrb[11].mxu0 }
 0x551   : > { %v1742_v0 = vpop.f32.mrb[8].mxu1 }
 0x552   : > { %v1193_v25 = vadd.f32 %v1742_v0, %v1570_v53  ;;  %v1178_v49 = vpop.f32.mrb[9].mxu1 }
 0x553   : > { %v1192_v27 = vadd.f32 %v1570_v53, %v1178_v49  ;;  %v1350_v54 = vpop.f32.mrb[12].mxu0 }
 0x554   : > { %1361 = vst.msk [vmem:[%s310_s24 + $0x8] sm:$0xff] %vm350_vm0, %v1193_v25  ;;  %v1351_v56 = vadd.f32 %v1350_v54, %v1280_v12  ;;  %v1788_v57 = vpop.f32.mrb[13].mxu0 }
 0x555   : > { %1360 = vst.msk [vmem:[%s310_s24] sm:$0xff] %vm350_vm0, %v1192_v27 }
 0x556   : > { %v1359_v58 = vadd.f32 %v1572_v55, %v1351_v56 }
 0x557   : > { %2124 = shalt.err (!%p2121_p7)
}
 0x558   : > { %s2125_s11 = scalar_lea.hbm %s2606_s12, 256  ;;  %s2129_s23 = scalar_lea.hbm %s2693_s4, 512 }
 0x559   : > { %p2126_p1 = scmp.ne.s32.totalorder %s2606_s12, %s2125_s11  ;;  %p2130_p0 = scmp.lt.u32.totalorder %s2606_s12, %s2693_s4 }
 0x55a   : > { %p2131_p9 = scmp.lt.u32.totalorder %s2129_s23, %s2125_s11  ;;  %p2133_p2 = scmp.lt.u32.totalorder %s2125_s11, %s2606_s12 }
 0x55b   : > { %p2127_p8 = pnand %p2126_p1, %p2719_p13 }
 0x55c   : > { %p2132_p12 = por %p2131_p9, %p2130_p0 }
 0x55d   : > { %p2128_p11 = pneg %p2127_p8 }
 0x55e   : > { %p2134_p6 = por %p2133_p2, %p2132_p12 }
 0x560   : > { %p2135_p10 = pnand %p2134_p6, %p2128_p11 }
 0x562   : > { %2138 = shalt.err (!%p2135_p10)
}
 0x563   : > { %s2235_s13 = smov 128   ;;  %s2236_s27 = smov 8   ;;  %1362 = vst.msk [vmem:[%s2611_s0] sm:$0xff] %vm350_vm0, %v1359_v58 }
 0x564   : > { %1909 = dma.vmem_to_hbm [thread:$0]  (%p2719_p13), %s2601_s29, 256, %s2606_s12, %s1364_s9, %s2235_s13, %s2235_s13, %s2236_s27  }
 0x565   : > { %s1369_s30 = scalar_lea.sflag [#allocation12], %s2472_s3  ;;  %s2139_s7 = scalar_lea.vmem %s2621_s6, 128 }
 0x566   : > { %p2140_p4 = scmp.ne.s32.totalorder %s2621_s6, %s2139_s7  ;;  %s2237_s15 = smov [#allocation11]  }
 0x567   : > { %s2143_s2 = sshll.u32 %s2237_s15, 4  ;;  %s2144_s2 = int_to_ptr.vmem [resolvable:$false] %s2143_s2 }
 0x568   : > { %p2141_p5 = pnand %p2140_p4, %p2719_p13  ;;  %s2145_s26 = scalar_lea.vmem %s2144_s2, 256 }
 0x569   : > { %p2146_p7 = scmp.lt.s32.totalorder %s2621_s6, %s2144_s2  ;;  %p2147_p1 = scmp.lt.s32.totalorder %s2145_s26, %s2139_s7 }
 0x56a   : > { %p2142_p3 = pneg %p2141_p5 }
 0x56b   : > { %p2148_p8 = por %p2147_p1, %p2146_p7 }
 0x56d   : > { %p2149_p11 = pnand %p2148_p8, %p2142_p3 }
 0x56f   : > { %2152 = shalt.err (!%p2149_p11)
}
 0x570   : > { %s2153_s3 = scalar_lea.hbm %s2619_s22, 128  ;;  %s2157_s0 = scalar_lea.hbm %s2694_s5, 256 }
 0x571   : > { %p2154_p0 = scmp.ne.s32.totalorder %s2619_s22, %s2153_s3  ;;  %p2158_p2 = scmp.lt.u32.totalorder %s2619_s22, %s2694_s5 }
 0x572   : > { %p2159_p6 = scmp.lt.u32.totalorder %s2157_s0, %s2153_s3  ;;  %p2161_p4 = scmp.lt.u32.totalorder %s2153_s3, %s2619_s22 }
 0x573   : > { %p2155_p9 = pnand %p2154_p0, %p2719_p13 }
 0x574   : > { %p2160_p10 = por %p2159_p6, %p2158_p2 }
 0x575   : > { %p2156_p12 = pneg %p2155_p9 }
 0x576   : > { %p2162_p5 = por %p2161_p4, %p2160_p10 }
 0x578   : > { %p2163_p3 = pnand %p2162_p5, %p2156_p12 }
 0x57a   : > { %2166 = shalt.err (!%p2163_p3)
}
 0x57b   : > { %1910 = dma.vmem_to_hbm [thread:$0]  (%p2719_p13), %s2621_s6, 128, %s2619_s22, %s1369_s30  }
 0x57c PF: > { %s1410_s28 = sand.u32 1, %s2209_s18   ;;  %p2720_p7 = scmp.ne.s32.totalorder %s2703_s25, 0 }
 0x57d   : > { %p2721_p1 = scmp.ge.s32.totalorder %s2221_s21, 2  ;;  %s1411_s24 = scalar_lea.sflag [#allocation4], %s1410_s28 }
 0x57f   : > { %p1928_p8 = pnand %p2721_p1, %p2720_p7 }
 0x581   : > { %2200 = dma.done.wait (!%p1928_p8), %s1411_s24, 256  }
 0x582   : > { %2202 = vsyncadd (!%p1928_p8), %s1411_s24, 4294967040  ;;  %s1420_s23 = scalar_lea.sflag [#allocation12], %s1410_s28 }
 0x583   : > { %2204 = dma.done.wait (!%p1928_p8), %s1420_s23, 128  }
 0x584   : > { %2206 = vsyncadd (!%p1928_p8), %s1420_s23, 4294967168  ;;  %p26_p13 = scmp.ge.s32.totalorder %s2378_s14, 4   ;;  %s2722_s18 = smov %s2213_s19 }
 0x585   : > { %s2723_s19 = smov %s2217_s20  ;;  %s2724_s20 = smov %s2394_s17 }
 0x586   : > { %s2725_s21 = smov %s2378_s14  ;;  %28 = sbr.rel (!%p26_p13) target bundleno = 14 (0xe), region = 120 }
 0x58d   :  { %1425 = vsyncpa [#allocation3], 1 }
 0x58e   :  { %1427 = vsyncpa [#allocation3 + $0x1], 1 }
 0x58f   :  { %1428 = vsyncpa [#allocation6], 1 }
 0x590   :  { %1430 = vsyncpa [#allocation6 + $0x1], 1 }
 0x591   :  { %1431 = vsyncpa [#allocation9], 1 }
 0x592   :  { %1432 = vsyncpa [#allocation4], 1 }
 0x593   :  { %1434 = vsyncpa [#allocation4 + $0x1], 1 }
 0x594   :  { %1435 = vsyncpa [#allocation12], 1 }
 0x595   :  { %1437 = vsyncpa [#allocation12 + $0x1], 1 }

</bundles_post_ra>
